<compile_context>
chip_gen: v7x
topology: tpu7x:2x2x1
jax: 0.10.0
libtpu: 0.0.40
codegen_flags: <defaults>
</compile_context>

<pallas_src>
import functools
import math

import jax
import jax.numpy as jnp
from jax.experimental import pallas as pl
from jax.experimental.pallas import tpu as pltpu


def _round_up(x: int, m: int) -> int:
    return ((x + m - 1) // m) * m


def _fast_recip(x):
    # EUP approximate reciprocal (separate issue slot) + one Newton-Raphson step
    # on the VPU -> ~f32 accuracy without the exact-divide path.
    r = pl.reciprocal(x, approx=True)
    return r * (2.0 - x * r)


def _recip_pow(t, power: float):
    """(1/t) ** power with trace-time specialization (t > 0)."""
    if power == 1.0:
        return _fast_recip(t)
    if power == 0.5:
        return jax.lax.rsqrt(t)
    if float(power).is_integer() and 1.0 < power <= 4.0:
        r = _fast_recip(t)
        out = r
        for _ in range(int(power) - 1):
            out = out * r
        return out
    if float(2.0 * power).is_integer() and 0.5 < power <= 4.5:
        # power = k + 0.5 -> rsqrt(t) * (1/t)**k   (one EUP op + cheap multiplies)
        k = int(power - 0.5)
        r = _fast_recip(t)
        out = jax.lax.rsqrt(t)
        for _ in range(k):
            out = out * r
        return out
    # Generic fallback (exp/log on the EUP).
    return _fast_recip(t) ** power


def _cluster_assignment_kernel(x_ref, ct_ref, csq_ref, mask_ref, o_ref, *,
                               inv_alpha: float, power: float,
                               apply_mask: bool, bf16_matmul: bool):
    # x_ref: (TB, D) batch tile, ct_ref: (D, Kp) pre-transposed centers (constant),
    # csq_ref: (1, Kp) precomputed ||c||^2, mask_ref: (1, Kp) 0/1 valid-cluster mask,
    # o_ref: (TB, Kp) lane-dense output tile.
    x = x_ref[...]            # (TB, D) f32
    ct = ct_ref[...]          # (D, Kp) f32
    c_sq = csq_ref[...]       # (1, Kp) f32

    # ||x - c||^2 = ||x||^2 + ||c||^2 - 2 <x, c>; cross term on the MXU as a
    # standard contraction against the lane-dense (D, Kp) centers.
    x_sq = jnp.sum(x * x, axis=-1, keepdims=True)                         # (TB, 1)
    if bf16_matmul:
        xc = jax.lax.dot_general(x.astype(jnp.bfloat16), ct.astype(jnp.bfloat16),
                                 (((1,), (0,)), ((), ())),
                                 preferred_element_type=jnp.float32)      # (TB, Kp)
    else:
        xc = jax.lax.dot_general(x, ct, (((1,), (0,)), ((), ())),
                                 preferred_element_type=jnp.float32)      # (TB, Kp)
    norm_sq = jnp.maximum(x_sq + c_sq - 2.0 * xc, 0.0)

    # Student's t kernel; 1/alpha folded into a constant multiply, pow specialized.
    t = 1.0 + norm_sq * inv_alpha
    numerator = _recip_pow(t, power)                                      # (TB, Kp)

    if apply_mask:
        # Multiplicative 0/1 row mask (after the pow -> no overflow risk) zeroes
        # the padded cluster columns so they don't pollute the denominator.
        numerator = numerator * mask_ref[...]

    denom = jnp.sum(numerator, axis=-1, keepdims=True)                    # (TB, 1)
    o_ref[...] = (numerator * _fast_recip(denom)).astype(o_ref.dtype)


def _vmem_budget_bytes() -> int:
    # ~75% of physical per-TensorCore VMEM: leaves headroom for Mosaic internal
    # scratch / semaphores.  v7x (64 MiB) -> ~48 MiB, v5e/v6e (128 MiB) -> ~96 MiB.
    cap = 64 * 1024 * 1024
    try:
        cap = int(pltpu.get_tpu_info().vmem_capacity_bytes)
    except Exception:
        pass
    return (cap * 3) // 4


def _footprint_bytes(block_b: int, d: int, k_pad: int) -> int:
    # Double-buffered (block_b, D) input and (block_b, K_pad) output tiles,
    # double-buffered (D, K_pad) centers + two (1, K_pad) rows, plus ~4
    # Mosaic-materialized (block_b, K_pad) f32 intermediates (xc, norm_sq, t, num).
    return 4 * (2 * block_b * d + 2 * d * k_pad + 4 * k_pad + 6 * block_b * k_pad)


def _choose_block_b(b: int, d: int, k_pad: int, vmem_budget: int) -> int:
    b_rounded = _round_up(b, 8)
    fixed = 4 * (2 * d * k_pad + 4 * k_pad)
    per_row = 4 * (2 * d + 6 * k_pad)
    max_rows = (vmem_budget - fixed) // per_row
    # TODO(synk): if max_rows < 8 (very large K*D) switch to a K grid axis with
    # two-pass normalization instead of shrinking the batch tile to nothing.
    max_rows = int(max(8, (max_rows // 8) * 8))
    if b_rounded <= 128:
        return max(8, min(b_rounded, max_rows))
    # Target >=4 grid steps so each of v7x's two TensorCores pipelines >=2
    # iterations, while keeping tiles in [128, 1024] rows to amortize the
    # ~0.35 us per-step overhead (bigger tiles allowed when VMEM permits).
    desired = _round_up(pl.cdiv(b, 4), 8)
    desired = max(128, min(desired, 1024, b_rounded))
    return max(8, min(desired, max_rows))


def cluster_assignment(batch: jax.Array, cluster_centers: jax.Array,
                       alpha: float = 1.0, *, block_b: int | None = None,
                       out_dtype=jnp.float32, bf16_matmul: bool = False) -> jax.Array:
    """Soft assignment: batch (B, D), cluster_centers (K, D) -> (B, K)."""
    B, D = batch.shape
    K, D2 = cluster_centers.shape
    assert D == D2, "embedding dims must match"

    batch = batch.astype(jnp.float32)
    centers = cluster_centers.astype(jnp.float32)

    # Lane-dense output: pad K up to a multiple of 128 (padded columns masked).
    k_pad = _round_up(max(K, 128), 128)
    centers_p = centers if k_pad == K else jnp.pad(centers, ((0, k_pad - K), (0, 0)))

    # Trace-time constants: transposed centers (D, K_pad), ||c||^2 row, valid mask.
    centers_t = centers_p.T
    c_sq = jnp.sum(centers_p * centers_p, axis=1)[None, :]               # (1, K_pad)
    mask = (jax.lax.broadcasted_iota(jnp.int32, (1, k_pad), 1) < K).astype(jnp.float32)

    vmem_budget = _vmem_budget_bytes()
    if block_b is None:
        block_b = _choose_block_b(B, D, k_pad, vmem_budget)
    assert block_b % 8 == 0, "block_b must be a multiple of 8"

    grid = (pl.cdiv(B, block_b),)   # no batch padding: partial last block is masked

    footprint = _footprint_bytes(block_b, D, k_pad)
    vmem_limit = int(min(vmem_budget,
                         max(footprint + footprint // 4, 32 * 1024 * 1024)))

    kernel = functools.partial(
        _cluster_assignment_kernel,
        inv_alpha=1.0 / float(alpha),
        power=float(alpha + 1.0) / 2.0,
        apply_mask=(K != k_pad),
        bf16_matmul=bool(bf16_matmul),
    )

    out = pl.pallas_call(
        kernel,
        out_shape=jax.ShapeDtypeStruct((B, k_pad), out_dtype),
        grid_spec=pltpu.PrefetchScalarGridSpec(
            num_scalar_prefetch=0,
            grid=grid,
            in_specs=[
                pl.BlockSpec((block_b, D), lambda i: (i, 0)),   # batch tile
                pl.BlockSpec((D, k_pad), lambda i: (0, 0)),     # transposed centers
                pl.BlockSpec((1, k_pad), lambda i: (0, 0)),     # ||c||^2 row
                pl.BlockSpec((1, k_pad), lambda i: (0, 0)),     # valid-cluster mask
            ],
            out_specs=pl.BlockSpec((block_b, k_pad), lambda i: (i, 0)),
        ),
        compiler_params=pltpu.CompilerParams(
            dimension_semantics=("parallel",),
            vmem_limit_bytes=vmem_limit,
        ),
    )(batch, centers_t, c_sq, mask)

    # Only the cluster-padding slice remains (no row slice since B is unpadded).
    return out if K == k_pad else out[:, :K]


def cluster_assignment_ref(batch, cluster_centers, alpha=1.0):
    # Pure-JAX reference mirroring the PyTorch forward exactly.
    diff = batch[:, None, :] - cluster_centers[None, :, :]
    norm_sq = jnp.sum(diff * diff, axis=2)
    numerator = 1.0 / (1.0 + norm_sq / alpha)
    numerator = numerator ** (float(alpha + 1) / 2.0)
    return numerator / jnp.sum(numerator, axis=1, keepdims=True)


if __name__ == "__main__":
    # Small shapes consistent with the module: batch of embeddings (B, D),
    # K cluster centers of dimension D.
    B, D, K = 16, 32, 4
    alpha = 1.0

    key = jax.random.PRNGKey(0)
    k_x, k_c = jax.random.split(key)

    batch = jax.random.normal(k_x, (B, D), dtype=jnp.float32)

    # nn.init.xavier_uniform_ on a (K, D) tensor: U(-a, a), a = sqrt(6 / (K + D)).
    bound = math.sqrt(6.0 / (K + D))
    cluster_centers = jax.random.uniform(
        k_c, (K, D), dtype=jnp.float32, minval=-bound, maxval=bound)

    out = cluster_assignment(batch, cluster_centers, alpha=alpha)
    out = jax.block_until_ready(out)

    ref = cluster_assignment_ref(batch, cluster_centers, alpha=alpha)
    assert out.shape == (B, K)
    assert jnp.allclose(out, ref, atol=1e-4, rtol=1e-4), "mismatch vs reference"
    # Rows of a soft assignment sum to 1.
    assert jnp.allclose(jnp.sum(out, axis=1), jnp.ones((B,)), atol=1e-4)

    print("KERNEL_OK")
</pallas_src>

<mosaic_0001>
module attributes {stable_mosaic.version = 11 : i64} {
  func.func @_cluster_assignment_kernel(%arg0: i32, %arg1: memref<16x32xf32, #tpu.memory_space<vmem>>, %arg2: memref<32x128xf32, #tpu.memory_space<vmem>>, %arg3: memref<1x128xf32, #tpu.memory_space<vmem>>, %arg4: memref<1x128xf32, #tpu.memory_space<vmem>>, %arg5: memref<16x128xf32, #tpu.memory_space<vmem>>) attributes {dimension_semantics = [#tpu.dimension_semantics<parallel>], iteration_bounds = array<i64: 1>, scalar_prefetch = 0 : i64, scratch_operands = 0 : i64, tpu.core_type = #tpu.core_type<tc>, window_params = [{transform_indices = @transform_0, window_bounds = array<i64: 16, 32>}, {pipeline_mode = #tpu.pipeline_mode<synchronous>, transform_indices = @transform_1, window_bounds = array<i64: 32, 128>}, {pipeline_mode = #tpu.pipeline_mode<synchronous>, transform_indices = @transform_2, window_bounds = array<i64: 1, 128>}, {pipeline_mode = #tpu.pipeline_mode<synchronous>, transform_indices = @transform_3, window_bounds = array<i64: 1, 128>}, {transform_indices = @transform_4, window_bounds = array<i64: 16, 128>}]} {
    %c0 = arith.constant 0 : index
    %c0_0 = arith.constant 0 : index
    %0 = vector.load %arg1[%c0, %c0_0] : memref<16x32xf32, #tpu.memory_space<vmem>>, vector<16x32xf32>
    %c0_1 = arith.constant 0 : index
    %c0_2 = arith.constant 0 : index
    %1 = vector.load %arg2[%c0_1, %c0_2] : memref<32x128xf32, #tpu.memory_space<vmem>>, vector<32x128xf32>
    %c0_3 = arith.constant 0 : index
    %c0_4 = arith.constant 0 : index
    %2 = vector.load %arg3[%c0_3, %c0_4] : memref<1x128xf32, #tpu.memory_space<vmem>>, vector<1x128xf32>
    %3 = arith.mulf %0, %0 : vector<16x32xf32>
    %cst = arith.constant dense<0.000000e+00> : vector<16xf32>
    %4 = vector.multi_reduction <add>, %3, %cst [1] : vector<16x32xf32> to vector<16xf32>
    %5 = vector.shape_cast %4 : vector<16xf32> to vector<16x1xf32>
    %cst_5 = arith.constant dense<0.000000e+00> : vector<16x128xf32>
    %6 = tpu.matmul %0, %1, %cst_5 {dimension_numbers = #tpu.dot_dimension_numbers<[1], [0], [0], [1], [0, 0, 1, 1], [], []>} : vector<16x32xf32>, vector<32x128xf32>, vector<16x128xf32> -> vector<16x128xf32>
    %7 = vector.broadcast %5 : vector<16x1xf32> to vector<16x128xf32>
    %8 = vector.broadcast %2 : vector<1x128xf32> to vector<16x128xf32>
    %9 = arith.addf %7, %8 : vector<16x128xf32>
    %cst_6 = arith.constant 2.000000e+00 : f32
    %10 = vector.broadcast %cst_6 : f32 to vector<16x128xf32>
    %11 = arith.mulf %10, %6 : vector<16x128xf32>
    %12 = arith.subf %9, %11 : vector<16x128xf32>
    %cst_7 = arith.constant 0.000000e+00 : f32
    %13 = vector.broadcast %cst_7 : f32 to vector<16x128xf32>
    %14 = arith.maximumf %12, %13 : vector<16x128xf32>
    %cst_8 = arith.constant 1.000000e+00 : f32
    %15 = vector.broadcast %cst_8 : f32 to vector<16x128xf32>
    %16 = arith.mulf %14, %15 : vector<16x128xf32>
    %cst_9 = arith.constant 1.000000e+00 : f32
    %17 = vector.broadcast %cst_9 : f32 to vector<16x128xf32>
    %18 = arith.addf %17, %16 : vector<16x128xf32>
    %19 = tpu.reciprocal %18 {approx = true} : vector<16x128xf32> -> vector<16x128xf32>
    %20 = arith.mulf %18, %19 : vector<16x128xf32>
    %cst_10 = arith.constant 2.000000e+00 : f32
    %21 = vector.broadcast %cst_10 : f32 to vector<16x128xf32>
    %22 = arith.subf %21, %20 : vector<16x128xf32>
    %23 = arith.mulf %19, %22 : vector<16x128xf32>
    %c0_11 = arith.constant 0 : index
    %c0_12 = arith.constant 0 : index
    %24 = vector.load %arg4[%c0_11, %c0_12] : memref<1x128xf32, #tpu.memory_space<vmem>>, vector<1x128xf32>
    %25 = vector.broadcast %24 : vector<1x128xf32> to vector<16x128xf32>
    %26 = arith.mulf %23, %25 : vector<16x128xf32>
    %cst_13 = arith.constant dense<0.000000e+00> : vector<16xf32>
    %27 = vector.multi_reduction <add>, %26, %cst_13 [1] : vector<16x128xf32> to vector<16xf32>
    %28 = vector.shape_cast %27 : vector<16xf32> to vector<16x1xf32>
    %29 = tpu.reciprocal %28 {approx = true} : vector<16x1xf32> -> vector<16x1xf32>
    %30 = arith.mulf %28, %29 : vector<16x1xf32>
    %cst_14 = arith.constant 2.000000e+00 : f32
    %31 = vector.broadcast %cst_14 : f32 to vector<16x1xf32>
    %32 = arith.subf %31, %30 : vector<16x1xf32>
    %33 = arith.mulf %29, %32 : vector<16x1xf32>
    %34 = vector.broadcast %33 : vector<16x1xf32> to vector<16x128xf32>
    %35 = arith.mulf %26, %34 : vector<16x128xf32>
    %c0_15 = arith.constant 0 : index
    %c0_16 = arith.constant 0 : index
    %36 = vector.load %arg5[%c0_15, %c0_16] : memref<16x128xf32, #tpu.memory_space<vmem>>, vector<16x128xf32>
    tpu.vector_store %arg5[%c0_15, %c0_16], %35 {strides = array<i32>} : memref<16x128xf32, #tpu.memory_space<vmem>>, vector<16x128xf32>,
    return
  }
  func.func @transform_0(%arg0: i32) -> (i32, i32) {
    %c0_i32 = arith.constant 0 : i32
    %c0_i32_0 = arith.constant 0 : i32
    return %arg0, %c0_i32 : i32, i32
  }
  func.func @transform_1(%arg0: i32) -> (i32, i32) {
    %c0_i32 = arith.constant 0 : i32
    %c0_i32_0 = arith.constant 0 : i32
    %c0_i32_1 = arith.constant 0 : i32
    return %c0_i32, %c0_i32_0 : i32, i32
  }
  func.func @transform_2(%arg0: i32) -> (i32, i32) {
    %c0_i32 = arith.constant 0 : i32
    %c0_i32_0 = arith.constant 0 : i32
    %c0_i32_1 = arith.constant 0 : i32
    return %c0_i32, %c0_i32_0 : i32, i32
  }
  func.func @transform_3(%arg0: i32) -> (i32, i32) {
    %c0_i32 = arith.constant 0 : i32
    %c0_i32_0 = arith.constant 0 : i32
    %c0_i32_1 = arith.constant 0 : i32
    return %c0_i32, %c0_i32_0 : i32, i32
  }
  func.func @transform_4(%arg0: i32) -> (i32, i32) {
    %c0_i32 = arith.constant 0 : i32
    %c0_i32_0 = arith.constant 0 : i32
    return %arg0, %c0_i32 : i32, i32
  }
}

</mosaic_0001>

<bundles_post_ra>
// kernel: tpu_custom_call.1
= control target key start
LH: loop header
LB: loop body
LE: loop exit
PB: predicated region body
PF: predicated region fallthrough
CT: control target
= control target key end

     0   :  { %9 = vsyncpa [#allocation3], 0  ;;  %s409_s0 = inlined_call_operand.hbm [shape: f32[16,32], index: 0, kind: input, shape index: {}]   ;;  %s410_s1 = inlined_call_operand.hbm [shape: f32[32,128], index: 1, kind: input, shape index: {}]   ;;  %s411_s2 = inlined_call_operand.vmem [shape: f32[1,128], index: 2, kind: input, shape index: {}]   ;;  %s412_s3 = inlined_call_operand.vmem [shape: f32[1,128], index: 3, kind: input, shape index: {}]   ;;  %s413_s4 = inlined_call_operand.hbm [shape: f32[16,128], index: 4, kind: output, shape index: {}]  }
   0x1   :  { %10 = vsyncpa [#allocation6], 0 }
   0x2   :  { %11 = vsyncpa [#allocation4], 0  ;;  %s324_s15 = smov [#allocation2]   ;;  %s252_s19 = scalar_lea.hbm %s409_s0, 256 }
   0x3   :  { %s17_s16 = sshll.u32 %s324_s15, 4  ;;  %p253_p0 = scmp.ne.s32.totalorder %s409_s0, %s252_s19  ;;  %s18_s16 = int_to_ptr.vmem [resolvable:$true] %s17_s16 }
   0x4   :  { %p256_p1 = scmp.lt.u32.totalorder %s252_s19, %s409_s0 }
   0x6   :  { %p258_p2 = pnand %p256_p1, %p253_p0 }
   0x8   :  { %261 = shalt.err (!%p258_p2)
}
   0x9   :  { %s262_s24 = scalar_lea.vmem %s18_s16, 256  ;;  %p267_p4 = scmp.lt.s32.totalorder %s18_s16, %s18_s16 }
   0xa   :  { %p263_p3 = scmp.ne.s32.totalorder %s18_s16, %s262_s24  ;;  %p268_p5 = scmp.lt.s32.totalorder %s262_s24, %s262_s24 }
   0xc   :  { %p269_p6 = por %p268_p5, %p267_p4 }
   0xe   :  { %p270_p7 = pnand %p269_p6, %p263_p3 }
  0x10   :  { %273 = shalt.err (!%p270_p7)
}
  0x11   :  { %s325_s25 = smov 128   ;;  %s326_s26 = smov 8  }
  0x12   :  { %23 = dma.hbm_to_vmem [thread:$0]  %s409_s0, 256, %s18_s16, [#allocation3], %s325_s25, %s325_s25, %s326_s26  }
  0x13   :  { %s327_s29 = smov [#allocation5]   ;;  %s274_s7 = scalar_lea.hbm %s410_s1, 512 }
  0x14   :  { %s29_s30 = sshll.u32 %s327_s29, 4  ;;  %p275_p8 = scmp.ne.s32.totalorder %s410_s1, %s274_s7  ;;  %s30_s30 = int_to_ptr.vmem [resolvable:$true] %s29_s30 }
  0x15   :  { %p278_p9 = scmp.lt.u32.totalorder %s274_s7, %s410_s1 }
  0x17   :  { %p280_p10 = pnand %p278_p9, %p275_p8 }
  0x19   :  { %283 = shalt.err (!%p280_p10)
}
  0x1a   :  { %s284_s12 = scalar_lea.vmem %s30_s30, 512  ;;  %p289_p12 = scmp.lt.s32.totalorder %s30_s30, %s30_s30 }
  0x1b   :  { %p285_p11 = scmp.ne.s32.totalorder %s30_s30, %s284_s12  ;;  %p290_p13 = scmp.lt.s32.totalorder %s284_s12, %s284_s12 }
  0x1d   :  { %p291_p0 = por %p290_p13, %p289_p12 }
  0x1f   :  { %p292_p1 = pnand %p291_p0, %p285_p11 }
  0x21   :  { %295 = shalt.err (!%p292_p1)
}
  0x22   :  { %35 = dma.hbm_to_vmem [thread:$0]  %s410_s1, 512, %s30_s30, [#allocation6], %s325_s25, %s325_s25, %s326_s26  }
  0x23   :  { %318 = dma.done.wait [#allocation3], 256  }
  0x24   :  { %319 = vsyncadd [#allocation3], 4294967040 }
  0x25   :  { %320 = dma.done.wait [#allocation6], 512  }
  0x26   :  { %321 = vsyncadd [#allocation6], 4294966784  ;;  %vm55_vm0 = vcmask 261120   ;;  %v48_v0 = vld [vmem:[#allocation5] sm:$0xff]  ;;  %v49_v1 = vld [vmem:[#allocation5 + $0x8] sm:$0xff]  ;;  %s328_s16 = smov [#allocation7]  }
  0x27   :  { %v50_v2 = vld [vmem:[#allocation5 + $0x10] sm:$0xff]  ;;  %v231_v3 = vpack.c.bf16 %v49_v1, %v48_v0  ;;  %v51_v4 = vld [vmem:[#allocation5 + $0x18] sm:$0xff] }
  0x28   :  { %v46_v5 = vld [vmem:[#allocation2] sm:$0xff]  ;;  %v47_v6 = vld [vmem:[#allocation2 + $0x8] sm:$0xff]  ;;  %v235_v7 = vpack.c.bf16 %v51_v4, %v50_v2 }
  0x29   :  { %v53_v8 = vmul.f32 %v46_v5, %v46_v5  ;;  %228 = vmatprep.mubr.msk.f32.mxu0 %vm55_vm0, %v46_v5  ;;  %v54_v9 = vmul.f32 %v47_v6, %v47_v6  ;;  %232 = vmatprep.subr.bf16.mxu0 %v231_v3  ;;  %v212_v13 = vld [vmem:[%s411_s2] ss:$0 sm:$0xff] }
  0x2a   :  { %234 = vmatpush3.bf16.msra.mxu0 %v231_v3  ;;  %v213_v33 = vld [vmem:[%s412_s3] ss:$0 sm:$0xff]  ;;  %s197_s3 = sshll.u32 %s328_s16, 4  ;;  %s198_s3 = int_to_ptr.vmem [resolvable:$true] %s197_s3 }
  0x2b   :  { %v56_v10 = vsel %vm55_vm0, %v53_v8, 0.0  ;;  %236 = vmatprep.subr.bf16.mxu0 %v235_v7  ;;  %v59_v11 = vsel %vm55_vm0, %v54_v9, 0.0  ;;  %s296_s17 = scalar_lea.vmem %s198_s3, 256  ;;  %p301_p3 = scmp.lt.s32.totalorder %s198_s3, %s198_s3 }
  0x2c   :  { %57 = vadd.xlane.f32.xlu0 %v56_v10  ;;  %p297_p2 = scmp.ne.s32.totalorder %s198_s3, %s296_s17  ;;  %p302_p4 = scmp.lt.s32.totalorder %s296_s17, %s296_s17 }
  0x2e   :  { %238 = vmatpush3.bf16.msra.mxu0 %v235_v7  ;;  %p303_p5 = por %p302_p4, %p301_p3 }
  0x30   :  { %60 = vadd.xlane.f32.xlu0 %v59_v11  ;;  %p304_p6 = pnand %p303_p5, %p297_p2 }
  0x31   :  { %229 = vmatmul.mubr.msk.f32.vlgmr.msra.gmra.mrb[0].mxu0 %vm55_vm0, %v47_v6 }
  0xb9   :  { %v58_v12 = vpop.xlane.xlu0 %57 }
  0xba   :  { %v149_v16 = vadd.f32 %v212_v13, %v58_v12 }
  0xbd   :  { %v61_v14 = vpop.xlane.xlu0 %60 }
  0xbe   :  { %v150_v15 = vadd.f32 %v212_v13, %v61_v14 }
 0x104   :  { %v230_v17 = vpop.f32.mrb[0].mxu0 }
 0x105   :  { %v152_v18 = vmul.f32 2.0, %v230_v17  ;;  %v134_v19 = vpop.f32.mrb[1].mxu0 }
 0x106   :  { %v151_v20 = vmul.f32 2.0, %v134_v19 }
 0x107   :  { %v154_v21 = vsub.f32 %v150_v15, %v152_v18 }
 0x108   :  { %v153_v22 = vsub.f32 %v149_v16, %v151_v20 }
 0x109   :  { %v156_v23 = vmax.f32 %v154_v21, 0.0 }
 0x10a   :  { %v155_v24 = vmax.f32 %v153_v22, 0.0 }
 0x10b   :  { %v158_v25 = vadd.f32 1.0, %v156_v23 }
 0x10c   :  { %v157_v26 = vadd.f32 1.0, %v155_v24 }
 0x10d   :  { %244 = vrcp.f32 %v158_v25 }
 0x10e   :  { %246 = vrcp.f32 %v157_v26 }
 0x117   :  { %v245_v27 = vpop.eup %244 }
 0x118   :  { %v247_v28 = vpop.eup %246  ;;  %v162_v29 = vmul.f32 %v245_v27, %v158_v25 }
 0x119   :  { %v161_v30 = vmul.f32 %v247_v28, %v157_v26 }
 0x11a   :  { %v164_v32 = vsub.f32 2.0, %v162_v29 }
 0x11b   :  { %v163_v31 = vsub.f32 2.0, %v161_v30 }
 0x11c   :  { %v166_v36 = vmul.f32 %v245_v27, %v164_v32 }
 0x11d   :  { %v165_v34 = vmul.f32 %v247_v28, %v163_v31 }
 0x11e   :  { %v175_v37 = vmul.f32 %v213_v33, %v166_v36 }
 0x11f   :  { %v174_v35 = vmul.f32 %v213_v33, %v165_v34 }
 0x121   :  { %176 = vadd.xlane.f32.xlu1 %v174_v35 }
 0x125   :  { %178 = vadd.xlane.f32.xlu1 %v175_v37 }
 0x1ae   :  { %v177_v38 = vpop.xlane.xlu1 %176 }
 0x1af   :  { %248 = vrcp.f32 %v177_v38 }
 0x1b2   :  { %v179_v39 = vpop.xlane.xlu1 %178 }
 0x1b3   :  { %250 = vrcp.f32 %v179_v39 }
 0x1b9   :  { %v249_v40 = vpop.eup %248 }
 0x1ba   :  { %v182_v41 = vmul.f32 %v249_v40, %v177_v38 }
 0x1bc   :  { %v184_v42 = vsub.f32 2.0, %v182_v41 }
 0x1bd   :  { %v251_v43 = vpop.eup %250 }
 0x1be   :  { %v186_v44 = vmul.f32 %v249_v40, %v184_v42  ;;  %v183_v45 = vmul.f32 %v251_v43, %v179_v39 }
 0x1c0   :  { %v185_v46 = vsub.f32 2.0, %v183_v45  ;;  %v188_v47 = vmul.f32 %v186_v44, %v174_v35 }
 0x1c2   :  { %v187_v48 = vmul.f32 %v251_v43, %v185_v46  ;;  %190 = vst [vmem:[#allocation7] sm:$0xff] %v188_v47 }
 0x1c4   :  { %v189_v49 = vmul.f32 %v187_v48, %v175_v37 }
 0x1c6   :  { %191 = vst [vmem:[#allocation7 + $0x8] sm:$0xff] %v189_v49 }
 0x1c7   :  { %307 = shalt.err (!%p304_p6)
}
 0x1c8   :  { %s308_s20 = scalar_lea.hbm %s413_s4, 256 }
 0x1c9   :  { %p309_p7 = scmp.ne.s32.totalorder %s413_s4, %s308_s20  ;;  %p312_p8 = scmp.lt.u32.totalorder %s308_s20, %s413_s4 }
 0x1cb   :  { %p314_p9 = pnand %p312_p8, %p309_p7 }
 0x1cd   :  { %317 = shalt.err (!%p314_p9)
}
 0x1ce   :  { %203 = dma.vmem_to_hbm [thread:$0]  %s198_s3, 256, %s413_s4, [#allocation4], %s325_s25, %s325_s25, %s326_s26  }
 0x1cf   :  { %322 = dma.done.wait [#allocation4], 256  }
 0x1d0   :  { %323 = vsyncadd [#allocation4], 4294967040 }
 0x1d1   :  { %207 = vsyncpa [#allocation3], 1 }
 0x1d2   :  { %208 = vsyncpa [#allocation6], 1 }
 0x1d3   :  { %209 = vsyncpa [#allocation4], 1 }

</bundles_post_ra>
